<compile_context>
chip_gen: v7x
topology: tpu7x:2x2x1
jax: 0.10.0
libtpu: 0.0.40
codegen_flags: <defaults>
</compile_context>

<pallas_src>
import jax
import jax.numpy as jnp
from jax import lax
from jax.experimental import pallas as pl
from jax.experimental.pallas import tpu as pltpu


def _build_row_toeplitz(w_oihw, W, k_pad):
    """Expand an OIHW 3x3 conv weight into a row-wise block-Toeplitz matrix.

    Returns T with shape (3*k_pad, W*Cout) such that, for lhs rows built as
        lhs[(b*H + i), dy*k_pad + ci*W + p] = x[b, ci, i + dy - 1, p]
    (zero when the row index i+dy-1 is out of range; lanes [Cin*W, k_pad) of
    each dy chunk are structural zeros), lhs @ T gives the conv output rows
        out[(b*H + i), j*Cout + co] = conv(x, w, k=3, s=1, p=1)[b, co, i, j].
    The width-wise (dx) zero padding is folded into the band by clipping the
    eye() diagonals at the edges, so no column padding is needed in the lhs.
    """
    Cout, Cin, KH, KW = w_oihw.shape
    assert (KH, KW) == (3, 3)
    wt = jnp.transpose(w_oihw, (2, 3, 1, 0)).astype(jnp.float32)  # (dy,dx,Cin,Cout)
    blocks = []
    for dy in range(3):
        t_dy = jnp.zeros((Cin, W, W, Cout), jnp.float32)
        for dx in range(3):
            # sel[p, j] == 1  iff  p == j + dx - 1  (dx-th diagonal, edge-clipped
            # so the W-padding contributes nothing).
            sel = jnp.eye(W, W, k=1 - dx, dtype=jnp.float32)
            t_dy = t_dy + jnp.einsum("pj,io->ipjo", sel, wt[dy, dx])
        t_dy = t_dy.reshape(Cin * W, W * Cout)
        t_dy = jnp.pad(t_dy, ((0, k_pad - Cin * W), (0, 0)))
        blocks.append(t_dy)
    return jnp.concatenate(blocks, axis=0)            # (3*k_pad, W*Cout)


def _conv3x3_kernel(x_ref, t_ref, out_ref, lhs_ref):
    # x_ref  : (B, Cin, H, W)   native NCHW input (no wrapper transpose)
    # t_ref  : (3*KP, W*Cout)   bf16 block-Toeplitz conv weights (VMEM resident)
    # out_ref: (B*H, W*Cout)    lane-dense f32 output rows
    # lhs_ref: (B, H, 3*KP)     f32 lhs assembly scratch
    B, Cin, H, W = x_ref.shape
    KP = lhs_ref.shape[-1] // 3
    WC = Cin * W
    f32 = jnp.float32

    # Structural zeros only: K-padding lanes of every dy chunk (their T rows
    # are zero, but VMEM scratch is uninitialized, so NaN/Inf garbage would
    # poison the f32 accumulation) plus the two H-halo rows.  No full-buffer
    # zero + overwrite; none of these writes overlap the data writes below.
    if KP > WC:
        zpad = jnp.zeros((B, H, KP - WC), f32)
        for dy in range(3):
            lhs_ref[:, :, dy * KP + WC:(dy + 1) * KP] = zpad
    zrow = jnp.zeros((B, 1, WC), f32)
    lhs_ref[:, 0:1, 0:WC] = zrow                        # top halo (dy = 0)
    lhs_ref[:, H - 1:H, 2 * KP:2 * KP + WC] = zrow      # bottom halo (dy = 2)

    # lhs assembly straight from NCHW: for every input channel, the three
    # dy-shifted copies of its (B, H, W) plane.  Each dy chunk starts at a
    # 128-aligned lane offset; the per-channel sub-offsets are narrow VMEM
    # slice copies (lane rotates on the XLU), far cheaper than the wrapper
    # NCHW->NHWC transpose (extra XLA dispatch + HBM round trip) they replace.
    x = x_ref[...]
    for ci in range(Cin):
        xc = x[:, ci, :, :]                                              # (B,H,W)
        lhs_ref[:, :, KP + ci * W:KP + (ci + 1) * W] = xc                # dy = 1
        lhs_ref[:, 1:H, ci * W:(ci + 1) * W] = xc[:, 0:H - 1, :]         # dy = 0
        lhs_ref[:, 0:H - 1, 2 * KP + ci * W:2 * KP + (ci + 1) * W] = xc[:, 1:H, :]  # dy = 2

    # Single bf16 MXU matmul, f32 accumulation: M=B*H, K=3*KP, N=W*Cout.
    lhs = lhs_ref[...].reshape(B * H, 3 * KP).astype(jnp.bfloat16)
    out_ref[...] = jnp.dot(
        lhs, t_ref[...], preferred_element_type=jnp.float32
    ).astype(out_ref.dtype)


def make_overlap_patch_embed(w_oihw, W):
    """Factory: returns a cached forward fn for OverlapPatchEmbed.

    The block-Toeplitz weight is built and cast to bf16 ONCE per parameter set
    (outside the per-forward path).
    """
    Cout, Cin, _, _ = w_oihw.shape
    KP = 128 * pl.cdiv(Cin * W, 128)          # per-dy K chunk, 128-lane aligned
    t_bf16 = _build_row_toeplitz(w_oihw, W, KP).astype(jnp.bfloat16)
    # TODO(synk): at realistic resolutions (W >~ 192) this O(W^2) Toeplitz
    # weight no longer fits VMEM (64 MiB/TC on v7x); switch to a W-tiled
    # banded-weight grid or an im2col formulation before leaving toy sizes.

    @jax.jit
    def forward(x_nchw):
        B, cin, H, w_dim = x_nchw.shape
        assert cin == Cin and w_dim == W
        out_rows = pl.pallas_call(
            _conv3x3_kernel,
            out_shape=jax.ShapeDtypeStruct((B * H, W * Cout), jnp.float32),
            grid_spec=pltpu.PrefetchScalarGridSpec(
                num_scalar_prefetch=0,
                # Whole problem in one step: latency/overhead-bound at this
                # size.  M = B*H = 32 underfills the MXU; batch more images per
                # call (M >= 128/256) before splitting the grid / TensorCores.
                grid=(1,),
                in_specs=[
                    pl.BlockSpec((B, Cin, H, W), lambda i: (0, 0, 0, 0)),
                    # Constant-indexed weight block: stays resident in VMEM.
                    pl.BlockSpec((3 * KP, W * Cout), lambda i: (0, 0)),
                ],
                out_specs=pl.BlockSpec((B * H, W * Cout), lambda i: (0, 0)),
                scratch_shapes=[pltpu.VMEM((B, H, 3 * KP), jnp.float32)],
            ),
            compiler_params=pltpu.CompilerParams(
                dimension_semantics=("arbitrary",)),
        )(x_nchw, t_bf16)
        # Free contiguous reshape + the one remaining interface transpose to
        # the PyTorch NCHW layout.  TODO(synk): keep the model NHWC end-to-end
        # and drop this transpose from the hot path.
        return jnp.transpose(out_rows.reshape(B, H, W, Cout), (0, 3, 1, 2))

    return forward


def overlap_patch_embed_reference(x_nchw, w_oihw):
    """Pure-JAX reference (same math as nn.Conv2d(k=3, s=1, p=1, bias=False))."""
    return lax.conv_general_dilated(
        x_nchw, w_oihw, window_strides=(1, 1), padding=((1, 1), (1, 1)),
        dimension_numbers=("NCHW", "OIHW", "NCHW"))


if __name__ == "__main__":
    B, Cin, H, W = 2, 3, 16, 16        # OverlapPatchEmbed default in_c=3
    Cout = 48                          # embed_dim=48

    key = jax.random.PRNGKey(0)
    kx, kw = jax.random.split(key)
    x = jax.random.normal(kx, (B, Cin, H, W), jnp.float32)
    w = jax.random.normal(kw, (Cout, Cin, 3, 3), jnp.float32) * 0.1

    forward = make_overlap_patch_embed(w, W)
    out = jax.block_until_ready(forward(x))
    assert out.shape == (B, Cout, H, W)

    # Operands are staged in bf16 (f32 accumulation): compare against a
    # reference with matching bf16 input/weight rounding ...
    xb = x.astype(jnp.bfloat16).astype(jnp.float32)
    wb = w.astype(jnp.bfloat16).astype(jnp.float32)
    ref_b = jax.block_until_ready(overlap_patch_embed_reference(xb, wb))
    err_b = float(jnp.abs(out - ref_b).max())
    assert jnp.allclose(out, ref_b, atol=1e-3, rtol=1e-3), err_b

    # ... and a coarse sanity check against the exact f32 conv.
    ref_f = jax.block_until_ready(overlap_patch_embed_reference(x, w))
    err_f = float(jnp.abs(out - ref_f).max())
    assert jnp.allclose(out, ref_f, atol=3e-2, rtol=3e-2), err_f

    print("KERNEL_OK")
</pallas_src>

<mosaic_0001>
module attributes {stable_mosaic.version = 11 : i64} {
  func.func @_conv3x3_kernel(%arg0: i32, %arg1: memref<2x3x16x16xf32, #tpu.memory_space<vmem>>, %arg2: memref<384x768xbf16, #tpu.memory_space<vmem>>, %arg3: memref<32x768xf32, #tpu.memory_space<vmem>>, %arg4: memref<2x16x384xf32, #tpu.memory_space<vmem>>) attributes {dimension_semantics = [#tpu.dimension_semantics<arbitrary>], iteration_bounds = array<i64: 1>, scalar_prefetch = 0 : i64, scratch_operands = 1 : i64, tpu.core_type = #tpu.core_type<tc>, window_params = [{pipeline_mode = #tpu.pipeline_mode<synchronous>, transform_indices = @transform_0, window_bounds = array<i64: 2, 3, 16, 16>}, {pipeline_mode = #tpu.pipeline_mode<synchronous>, transform_indices = @transform_1, window_bounds = array<i64: 384, 768>}, {pipeline_mode = #tpu.pipeline_mode<synchronous>, transform_indices = @transform_2, window_bounds = array<i64: 32, 768>}]} {
    %cst = arith.constant 0.000000e+00 : f32
    %0 = vector.broadcast %cst : f32 to vector<2x16x80xf32>
    %c0 = arith.constant 0 : index
    %c0_0 = arith.constant 0 : index
    %c48 = arith.constant 48 : index
    %1 = vector.load %arg4[%c0, %c0_0, %c48] : memref<2x16x384xf32, #tpu.memory_space<vmem>>, vector<2x16x80xf32>
    tpu.vector_store %arg4[%c0, %c0_0, %c48], %0 {strides = array<i32>} : memref<2x16x384xf32, #tpu.memory_space<vmem>>, vector<2x16x80xf32>,
    %c0_1 = arith.constant 0 : index
    %c0_2 = arith.constant 0 : index
    %c176 = arith.constant 176 : index
    %2 = vector.load %arg4[%c0_1, %c0_2, %c176] : memref<2x16x384xf32, #tpu.memory_space<vmem>>, vector<2x16x80xf32>
    tpu.vector_store %arg4[%c0_1, %c0_2, %c176], %0 {strides = array<i32>} : memref<2x16x384xf32, #tpu.memory_space<vmem>>, vector<2x16x80xf32>,
    %c0_3 = arith.constant 0 : index
    %c0_4 = arith.constant 0 : index
    %c304 = arith.constant 304 : index
    %3 = vector.load %arg4[%c0_3, %c0_4, %c304] : memref<2x16x384xf32, #tpu.memory_space<vmem>>, vector<2x16x80xf32>
    tpu.vector_store %arg4[%c0_3, %c0_4, %c304], %0 {strides = array<i32>} : memref<2x16x384xf32, #tpu.memory_space<vmem>>, vector<2x16x80xf32>,
    %cst_5 = arith.constant 0.000000e+00 : f32
    %4 = vector.broadcast %cst_5 : f32 to vector<2x1x48xf32>
    %c0_6 = arith.constant 0 : index
    %c0_7 = arith.constant 0 : index
    %c0_8 = arith.constant 0 : index
    %5 = vector.load %arg4[%c0_6, %c0_7, %c0_8] : memref<2x16x384xf32, #tpu.memory_space<vmem>>, vector<2x1x48xf32>
    tpu.vector_store %arg4[%c0_6, %c0_7, %c0_8], %4 {strides = array<i32>} : memref<2x16x384xf32, #tpu.memory_space<vmem>>, vector<2x1x48xf32>,
    %c0_9 = arith.constant 0 : index
    %c15 = arith.constant 15 : index
    %c256 = arith.constant 256 : index
    %6 = vector.load %arg4[%c0_9, %c15, %c256] : memref<2x16x384xf32, #tpu.memory_space<vmem>>, vector<2x1x48xf32>
    tpu.vector_store %arg4[%c0_9, %c15, %c256], %4 {strides = array<i32>} : memref<2x16x384xf32, #tpu.memory_space<vmem>>, vector<2x1x48xf32>,
    %c0_10 = arith.constant 0 : index
    %c0_11 = arith.constant 0 : index
    %c0_12 = arith.constant 0 : index
    %c0_13 = arith.constant 0 : index
    %7 = vector.load %arg1[%c0_10, %c0_11, %c0_12, %c0_13] : memref<2x3x16x16xf32, #tpu.memory_space<vmem>>, vector<2x3x16x16xf32>
    %8 = vector.extract_strided_slice %7 {offsets = [0, 0, 0, 0], sizes = [2, 1, 16, 16], strides = [1, 1, 1, 1]} : vector<2x3x16x16xf32> to vector<2x1x16x16xf32>
    %9 = vector.shape_cast %8 : vector<2x1x16x16xf32> to vector<2x16x16xf32>
    %c0_14 = arith.constant 0 : index
    %c0_15 = arith.constant 0 : index
    %c128 = arith.constant 128 : index
    %10 = vector.load %arg4[%c0_14, %c0_15, %c128] : memref<2x16x384xf32, #tpu.memory_space<vmem>>, vector<2x16x16xf32>
    tpu.vector_store %arg4[%c0_14, %c0_15, %c128], %9 {strides = array<i32>} : memref<2x16x384xf32, #tpu.memory_space<vmem>>, vector<2x16x16xf32>,
    %11 = vector.extract_strided_slice %9 {offsets = [0, 0, 0], sizes = [2, 15, 16], strides = [1, 1, 1]} : vector<2x16x16xf32> to vector<2x15x16xf32>
    %c0_16 = arith.constant 0 : index
    %c1 = arith.constant 1 : index
    %c0_17 = arith.constant 0 : index
    %12 = vector.load %arg4[%c0_16, %c1, %c0_17] : memref<2x16x384xf32, #tpu.memory_space<vmem>>, vector<2x15x16xf32>
    tpu.vector_store %arg4[%c0_16, %c1, %c0_17], %11 {strides = array<i32>} : memref<2x16x384xf32, #tpu.memory_space<vmem>>, vector<2x15x16xf32>,
    %13 = vector.extract_strided_slice %9 {offsets = [0, 1, 0], sizes = [2, 15, 16], strides = [1, 1, 1]} : vector<2x16x16xf32> to vector<2x15x16xf32>
    %c0_18 = arith.constant 0 : index
    %c0_19 = arith.constant 0 : index
    %c256_20 = arith.constant 256 : index
    %14 = vector.load %arg4[%c0_18, %c0_19, %c256_20] : memref<2x16x384xf32, #tpu.memory_space<vmem>>, vector<2x15x16xf32>
    tpu.vector_store %arg4[%c0_18, %c0_19, %c256_20], %13 {strides = array<i32>} : memref<2x16x384xf32, #tpu.memory_space<vmem>>, vector<2x15x16xf32>,
    %15 = vector.extract_strided_slice %7 {offsets = [0, 1, 0, 0], sizes = [2, 1, 16, 16], strides = [1, 1, 1, 1]} : vector<2x3x16x16xf32> to vector<2x1x16x16xf32>
    %16 = vector.shape_cast %15 : vector<2x1x16x16xf32> to vector<2x16x16xf32>
    %c0_21 = arith.constant 0 : index
    %c0_22 = arith.constant 0 : index
    %c144 = arith.constant 144 : index
    %17 = vector.load %arg4[%c0_21, %c0_22, %c144] : memref<2x16x384xf32, #tpu.memory_space<vmem>>, vector<2x16x16xf32>
    tpu.vector_store %arg4[%c0_21, %c0_22, %c144], %16 {strides = array<i32>} : memref<2x16x384xf32, #tpu.memory_space<vmem>>, vector<2x16x16xf32>,
    %18 = vector.extract_strided_slice %16 {offsets = [0, 0, 0], sizes = [2, 15, 16], strides = [1, 1, 1]} : vector<2x16x16xf32> to vector<2x15x16xf32>
    %c0_23 = arith.constant 0 : index
    %c1_24 = arith.constant 1 : index
    %c16 = arith.constant 16 : index
    %19 = vector.load %arg4[%c0_23, %c1_24, %c16] : memref<2x16x384xf32, #tpu.memory_space<vmem>>, vector<2x15x16xf32>
    tpu.vector_store %arg4[%c0_23, %c1_24, %c16], %18 {strides = array<i32>} : memref<2x16x384xf32, #tpu.memory_space<vmem>>, vector<2x15x16xf32>,
    %20 = vector.extract_strided_slice %16 {offsets = [0, 1, 0], sizes = [2, 15, 16], strides = [1, 1, 1]} : vector<2x16x16xf32> to vector<2x15x16xf32>
    %c0_25 = arith.constant 0 : index
    %c0_26 = arith.constant 0 : index
    %c272 = arith.constant 272 : index
    %21 = vector.load %arg4[%c0_25, %c0_26, %c272] : memref<2x16x384xf32, #tpu.memory_space<vmem>>, vector<2x15x16xf32>
    tpu.vector_store %arg4[%c0_25, %c0_26, %c272], %20 {strides = array<i32>} : memref<2x16x384xf32, #tpu.memory_space<vmem>>, vector<2x15x16xf32>,
    %22 = vector.extract_strided_slice %7 {offsets = [0, 2, 0, 0], sizes = [2, 1, 16, 16], strides = [1, 1, 1, 1]} : vector<2x3x16x16xf32> to vector<2x1x16x16xf32>
    %23 = vector.shape_cast %22 : vector<2x1x16x16xf32> to vector<2x16x16xf32>
    %c0_27 = arith.constant 0 : index
    %c0_28 = arith.constant 0 : index
    %c160 = arith.constant 160 : index
    %24 = vector.load %arg4[%c0_27, %c0_28, %c160] : memref<2x16x384xf32, #tpu.memory_space<vmem>>, vector<2x16x16xf32>
    tpu.vector_store %arg4[%c0_27, %c0_28, %c160], %23 {strides = array<i32>} : memref<2x16x384xf32, #tpu.memory_space<vmem>>, vector<2x16x16xf32>,
    %25 = vector.extract_strided_slice %23 {offsets = [0, 0, 0], sizes = [2, 15, 16], strides = [1, 1, 1]} : vector<2x16x16xf32> to vector<2x15x16xf32>
    %c0_29 = arith.constant 0 : index
    %c1_30 = arith.constant 1 : index
    %c32 = arith.constant 32 : index
    %26 = vector.load %arg4[%c0_29, %c1_30, %c32] : memref<2x16x384xf32, #tpu.memory_space<vmem>>, vector<2x15x16xf32>
    tpu.vector_store %arg4[%c0_29, %c1_30, %c32], %25 {strides = array<i32>} : memref<2x16x384xf32, #tpu.memory_space<vmem>>, vector<2x15x16xf32>,
    %27 = vector.extract_strided_slice %23 {offsets = [0, 1, 0], sizes = [2, 15, 16], strides = [1, 1, 1]} : vector<2x16x16xf32> to vector<2x15x16xf32>
    %c0_31 = arith.constant 0 : index
    %c0_32 = arith.constant 0 : index
    %c288 = arith.constant 288 : index
    %28 = vector.load %arg4[%c0_31, %c0_32, %c288] : memref<2x16x384xf32, #tpu.memory_space<vmem>>, vector<2x15x16xf32>
    tpu.vector_store %arg4[%c0_31, %c0_32, %c288], %27 {strides = array<i32>} : memref<2x16x384xf32, #tpu.memory_space<vmem>>, vector<2x15x16xf32>,
    %c0_33 = arith.constant 0 : index
    %c0_34 = arith.constant 0 : index
    %c0_35 = arith.constant 0 : index
    %29 = vector.load %arg4[%c0_33, %c0_34, %c0_35] : memref<2x16x384xf32, #tpu.memory_space<vmem>>, vector<2x16x384xf32>
    %30 = vector.shape_cast %29 : vector<2x16x384xf32> to vector<32x384xf32>
    %31 = arith.truncf %30 : vector<32x384xf32> to vector<32x384xbf16>
    %c0_36 = arith.constant 0 : index
    %c0_37 = arith.constant 0 : index
    %32 = vector.load %arg2[%c0_36, %c0_37] : memref<384x768xbf16, #tpu.memory_space<vmem>>, vector<384x768xbf16>
    %cst_38 = arith.constant dense<0.000000e+00> : vector<32x768xf32>
    %33 = tpu.matmul %31, %32, %cst_38 {dimension_numbers = #tpu.dot_dimension_numbers<[1], [0], [0], [1], [0, 0, 1, 1], [], []>} : vector<32x384xbf16>, vector<384x768xbf16>, vector<32x768xf32> -> vector<32x768xf32>
    %c0_39 = arith.constant 0 : index
    %c0_40 = arith.constant 0 : index
    %34 = vector.load %arg3[%c0_39, %c0_40] : memref<32x768xf32, #tpu.memory_space<vmem>>, vector<32x768xf32>
    tpu.vector_store %arg3[%c0_39, %c0_40], %33 {strides = array<i32>} : memref<32x768xf32, #tpu.memory_space<vmem>>, vector<32x768xf32>,
    return
  }
  func.func @transform_0(%arg0: i32) -> (i32, i32, i32, i32) {
    %c0_i32 = arith.constant 0 : i32
    %c0_i32_0 = arith.constant 0 : i32
    %c0_i32_1 = arith.constant 0 : i32
    %c0_i32_2 = arith.constant 0 : i32
    %c0_i32_3 = arith.constant 0 : i32
    return %c0_i32, %c0_i32_0, %c0_i32_1, %c0_i32_2 : i32, i32, i32, i32
  }
  func.func @transform_1(%arg0: i32) -> (i32, i32) {
    %c0_i32 = arith.constant 0 : i32
    %c0_i32_0 = arith.constant 0 : i32
    %c0_i32_1 = arith.constant 0 : i32
    return %c0_i32, %c0_i32_0 : i32, i32
  }
  func.func @transform_2(%arg0: i32) -> (i32, i32) {
    %c0_i32 = arith.constant 0 : i32
    %c0_i32_0 = arith.constant 0 : i32
    %c0_i32_1 = arith.constant 0 : i32
    return %c0_i32, %c0_i32_0 : i32, i32
  }
}

</mosaic_0001>

<bundles_post_ra>
// kernel: forward.1
= control target key start
LH: loop header
LB: loop body
LE: loop exit
PB: predicated region body
PF: predicated region fallthrough
CT: control target
= control target key end

     0   :  { %vm12_vm0 = vcmask 1047936   ;;  %v1833_v2 = vmov 0.0   ;;  %vm25_vm1 = vcmask 385024   ;;  %s1834_s13 = smov 16   ;;  %vm51_vm2 = vcmask 1040384   ;;  %s1835_s4 = smov 32   ;;  %s2500_s0 = inlined_call_operand.vmem [shape: f32[2,3,16,16], index: 0, kind: input, shape index: {}]   ;;  %s2501_s1 = inlined_call_operand.vmem [shape: bf16[384,768], index: 1, kind: input, shape index: {}]   ;;  %s2502_s2 = inlined_call_operand.vmem [shape: f32[32,768], index: 2, kind: output, shape index: {}]  }
   0x1   :  { %v32_v0 = vld [vmem:[%s2500_s0 + $0x10] sm:$0xff]  ;;  %v33_v1 = vld [vmem:[%s2500_s0 + $0x18] sm:$0xff]  ;;  %17 = vst.msk [vmem:[#allocation2 + $0x8] sm:$0xff] %vm12_vm0, %v1833_v2  ;;  %13 = vst.msk [vmem:[#allocation2] sm:$0xff] %vm12_vm0, %v1833_v2  ;;  %vm67_vm3 = vcmask 1046528   ;;  %vm42_vm4 = vcmask 130048  }
   0x2   :  { %14 = vst.msk [vmem:[#allocation2 + $0x18] sm:$0xff] %vm12_vm0, %v1833_v2  ;;  %15 = vst.msk [vmem:[#allocation2 + $0x30] sm:$0xff] %vm12_vm0, %v1833_v2  ;;  %87 = vrot.lane.b32.xlu0 %v32_v0, %s1834_s13  ;;  %v104_v3 = vrot.slane %v32_v0, 7  ;;  %v105_v4 = vrot.slane %v33_v1, 7  ;;  %v127_v5 = vrot.slane %v32_v0, 1  ;;  %v128_v6 = vrot.slane %v33_v1, 1 }
   0x3   :  { %16 = vst.msk [vmem:[#allocation2 + $0x48] sm:$0xff] %vm12_vm0, %v1833_v2  ;;  %18 = vst.msk [vmem:[#allocation2 + $0x20] sm:$0xff] %vm12_vm0, %v1833_v2  ;;  %v1617_v8 = vld [vmem:[%s2501_s1 + $0x4] ss:$24 sps:$4 sm:$0xff]   ;;  %v1619_v9 = vld [vmem:[%s2501_s1] ss:$24 sps:$4 sm:$0xff]  }
   0x4   :  { %19 = vst.msk [vmem:[#allocation2 + $0x38] sm:$0xff] %vm12_vm0, %v1833_v2  ;;  %20 = vst.msk [vmem:[#allocation2 + $0x50] sm:$0xff] %vm12_vm0, %v1833_v2  ;;  %110 = vrot.lane.b32.xlu1 %v104_v3, %s1834_s13  ;;  %v106_v7 = vsel %vm51_vm2, %v104_v3, %v105_v4  ;;  %v129_v10 = vsel %vm67_vm3, %v127_v5, %v128_v6  ;;  %1099 = vmatprep.subr.bf16.mxu1 %v1617_v8  ;;  %v1620_v11 = vld [vmem:[%s2501_s1 + $0x34] ss:$24 sps:$4 sm:$0xff]   ;;  %v34_v12 = vld [vmem:[%s2500_s0 + $0x20] sm:$0xff]  ;;  %vm62_vm5 = vcmask 130049  }
   0x5   :  { %21 = vst.msk [vmem:[#allocation2 + $0x10] sm:$0xff] %vm12_vm0, %v1833_v2  ;;  %22 = vst.msk [vmem:[#allocation2 + $0x28] sm:$0xff] %vm12_vm0, %v1833_v2  ;;  %1100 = vmatpush1.bf16.msra.mxu1 %v1619_v9  ;;  %v1622_v13 = vld [vmem:[%s2501_s1 + $0x30] ss:$24 sps:$4 sm:$0xff]   ;;  %v1623_v14 = vld [vmem:[%s2501_s1 + $0x64] ss:$24 sps:$4 sm:$0xff]  }
   0x6   :  { %23 = vst.msk [vmem:[#allocation2 + $0x40] sm:$0xff] %vm12_vm0, %v1833_v2  ;;  %24 = vst.msk [vmem:[#allocation2 + $0x58] sm:$0xff] %vm12_vm0, %v1833_v2  ;;  %89 = vrot.lane.b32.xlu0 %v33_v1, %s1834_s13  ;;  %1101 = vmatprep.subr.bf16.mxu1 %v1620_v11  ;;  %v35_v15 = vld [vmem:[%s2500_s0 + $0x28] sm:$0xff]  ;;  %v1625_v16 = vld [vmem:[%s2501_s1 + $0x60] ss:$24 sps:$4 sm:$0xff]   ;;  %v171_v18 = vrot.slane %v34_v12, 7 }
   0x7   :  { %26 = vst.msk [vmem:[#allocation2] sm:$0x1] %vm25_vm1, %v1833_v2  ;;  %27 = vst.msk [vmem:[#allocation2 + $0x30] sm:$0x1] %vm25_vm1, %v1833_v2  ;;  %v172_v17 = vrot.slane %v35_v15, 7  ;;  %v194_v20 = vrot.slane %v34_v12, 1 }
   0x8   :  { %28 = vst.msk [vmem:[#allocation2 + $0x2f] sm:$0x1] %vm25_vm1, %v1833_v2  ;;  %29 = vst.msk [vmem:[#allocation2 + $0x5f] sm:$0x1] %vm25_vm1, %v1833_v2  ;;  %112 = vrot.lane.b32.xlu1 %v106_v7, %s1834_s13  ;;  %v1626_v19 = vld [vmem:[%s2501_s1 + $0x94] ss:$24 sps:$4 sm:$0xff]  }
   0x9   :  { %1102 = vmatpush1.bf16.msra.mxu1 %v1622_v13  ;;  %v195_v21 = vrot.slane %v35_v15, 1  ;;  %v1628_v22 = vld [vmem:[%s2501_s1 + $0x90] ss:$24 sps:$4 sm:$0xff]   ;;  %v173_v23 = vsel %vm51_vm2, %v171_v18, %v172_v17  ;;  %v1629_v24 = vld [vmem:[%s2501_s1 + $0xc4] ss:$24 sps:$4 sm:$0xff]   ;;  %vm79_vm6 = vcmask 129024  }
   0xa   :  { %133 = vrot.lane.b32.xlu0 %v129_v10, %s1834_s13  ;;  %1103 = vmatprep.subr.bf16.mxu1 %v1623_v14  ;;  %v1646_v25 = vld [vmem:[%s2501_s1 + $0x304] ss:$24 sps:$4 sm:$0xff]   ;;  %v1631_v27 = vld [vmem:[%s2501_s1 + $0xc0] ss:$24 sps:$4 sm:$0xff]   ;;  %v1632_v31 = vld [vmem:[%s2501_s1 + $0xf4] ss:$24 sps:$4 sm:$0xff]  }
   0xb   :  { %v196_v26 = vsel %vm67_vm3, %v194_v20, %v195_v21  ;;  %v1649_v28 = vld [vmem:[%s2501_s1 + $0x300] ss:$24 sps:$4 sm:$0xff]   ;;  %1152 = vmatprep.subr.bf16.mxu0 %v1646_v25  ;;  %v1652_v34 = vld [vmem:[%s2501_s1 + $0x334] ss:$24 sps:$4 sm:$0xff]   ;;  %v1655_v36 = vld [vmem:[%s2501_s1 + $0x330] ss:$24 sps:$4 sm:$0xff]  }
   0xc   :  { %135 = vrot.lane.b32.xlu1 %v128_v6, %s1834_s13  ;;  %v30_v29 = vld [vmem:[%s2500_s0] sm:$0xff]  ;;  %v39_v35 = vld [vmem:[%s2500_s0 + $0x48] sm:$0xff]  ;;  %1153 = vmatpush1.bf16.msra.mxu0 %v1649_v28  ;;  %v1836_v41 = vmov 0   ;;  %v40_v57 = vld [vmem:[%s2500_s0 + $0x50] sm:$0xff]  ;;  %vm99_vm7 = vcmask 261248   ;;  %vm122_vm8 = vcmask 261249  }
   0xd   :  { %1104 = vmatpush1.bf16.msra.mxu1 %v1625_v16  ;;  %v38_v30 = vld [vmem:[%s2500_s0 + $0x40] sm:$0xff]  ;;  %43 = vst.msk [vmem:[#allocation2 + $0x8] sm:$0xff] %vm42_vm4, %v30_v29  ;;  %v52_v32 = vrot.slane %v30_v29, 7  ;;  %v68_v33 = vrot.slane %v30_v29, 1  ;;  %v31_v37 = vld [vmem:[%s2500_s0 + $0x8] sm:$0xff]  ;;  %1154 = vmatprep.subr.bf16.mxu0 %v1652_v34  ;;  %v108_v43 = vrot.slane %v39_v35, 7 }
   0xe   :  { %154 = vrot.lane.b32.xlu0 %v34_v12, %s1835_s4  ;;  %1105 = vmatprep.subr.bf16.mxu1 %v1626_v19  ;;  %v1634_v38 = vld [vmem:[%s2501_s1 + $0xf0] ss:$24 sps:$4 sm:$0xff]   ;;  %44 = vst.msk [vmem:[#allocation2 + $0x20] sm:$0xff] %vm42_vm4, %v31_v37  ;;  %v53_v39 = vrot.slane %v31_v37, 7  ;;  %v69_v40 = vrot.slane %v31_v37, 1  ;;  %v107_v44 = vrot.slane %v38_v30, 7 }
   0xf   :  { %63 = vst.msk [vmem:[#allocation2] sm:$0xfe] %vm62_vm5, %v52_v32  ;;  %1184 = vmatprep.mubr.bf16.mxu0 %v1836_v41  ;;  %v1658_v42 = vld [vmem:[%s2501_s1 + $0x364] ss:$24 sps:$4 sm:$0xff]   ;;  %v1661_v48 = vld [vmem:[%s2501_s1 + $0x360] ss:$24 sps:$4 sm:$0xff]  }
  0x10   :  { %156 = vrot.lane.b32.xlu1 %v35_v15, %s1835_s4  ;;  %v1635_v45 = vld [vmem:[%s2501_s1 + $0x124] ss:$24 sps:$4 sm:$0xff]   ;;  %v54_v46 = vsel %vm51_vm2, %v52_v32, %v53_v39  ;;  %v70_v47 = vsel %vm67_vm3, %v68_v33, %v69_v40  ;;  %80 = vst.msk [vmem:[#allocation2 + $0x28] sm:$0x7f] %vm79_vm6, %v69_v40  ;;  %1155 = vmatpush1.bf16.msra.mxu0 %v1655_v36  ;;  %v130_v49 = vrot.slane %v38_v30, 1  ;;  %v131_v50 = vrot.slane %v39_v35, 1 }
  0x11   :  { %1106 = vmatpush1.bf16.msra.mxu1 %v1628_v22  ;;  %64 = vst.msk [vmem:[#allocation2 + $0x18] sm:$0xff] %vm42_vm4, %v54_v46  ;;  %78 = vst.msk [vmem:[#allocation2 + $0x10] sm:$0xff] %vm42_vm4, %v70_v47  ;;  %1156 = vmatprep.subr.bf16.mxu0 %v1658_v42  ;;  %v1664_v51 = vld [vmem:[%s2501_s1 + $0x394] ss:$24 sps:$4 sm:$0xff]   ;;  %v1637_v52 = vld [vmem:[%s2501_s1 + $0x120] ss:$24 sps:$4 sm:$0xff]   ;;  %v109_v53 = vsel %vm51_vm2, %v107_v44, %v108_v43 }
  0x12   :  { %177 = vrot.lane.b32.xlu0 %v171_v18, %s1835_s4  ;;  %1107 = vmatprep.subr.bf16.mxu1 %v1629_v24  ;;  %v1638_v54 = vld [vmem:[%s2501_s1 + $0x154] ss:$24 sps:$4 sm:$0xff]   ;;  %v1667_v55 = vld [vmem:[%s2501_s1 + $0x390] ss:$24 sps:$4 sm:$0xff]   ;;  %v132_v56 = vsel %vm67_vm3, %v130_v49, %v131_v50  ;;  %v1670_v58 = vld [vmem:[%s2501_s1 + $0x3c4] ss:$24 sps:$4 sm:$0xff]  }
  0x13   :  { %v1640_v59 = vld [vmem:[%s2501_s1 + $0x150] ss:$24 sps:$4 sm:$0xff]   ;;  %v41_v60 = vld [vmem:[%s2500_s0 + $0x58] sm:$0xff]  ;;  %v1676_v0 = vld [vmem:[%s2501_s1 + $0x3f4] ss:$24 sps:$4 sm:$0xff]   ;;  %v174_v2 = vrot.slane %v40_v57, 7 }
  0x14   :  { %179 = vrot.lane.b32.xlu1 %v173_v23, %s1835_s4  ;;  %1157 = vmatpush1.bf16.msra.mxu0 %v1661_v48  ;;  %v1641_v61 = vld [vmem:[%s2501_s1 + $0x184] ss:$24 sps:$4 sm:$0xff]   ;;  %v1673_v62 = vld [vmem:[%s2501_s1 + $0x3c0] ss:$24 sps:$4 sm:$0xff]   ;;  %v175_v1 = vrot.slane %v41_v60, 7  ;;  %v36_v4 = vld [vmem:[%s2500_s0 + $0x30] sm:$0xff] }
  0x15   :  { %1108 = vmatpush1.bf16.msra.mxu1 %v1631_v27  ;;  %1158 = vmatprep.subr.bf16.mxu0 %v1664_v51  ;;  %v1643_v63 = vld [vmem:[%s2501_s1 + $0x180] ss:$24 sps:$4 sm:$0xff]   ;;  %v1644_v3 = vld [vmem:[%s2501_s1 + $0x1b4] ss:$24 sps:$4 sm:$0xff]   ;;  %45 = vst.msk [vmem:[#allocation2 + $0x38] sm:$0xff] %vm42_vm4, %v36_v4  ;;  %v71_v6 = vrot.slane %v36_v4, 1 }
  0x16   :  { %200 = vrot.lane.b32.xlu0 %v196_v26, %s1835_s4  ;;  %1109 = vmatprep.subr.bf16.mxu1 %v1632_v31  ;;  %v37_v5 = vld [vmem:[%s2500_s0 + $0x38] sm:$0xff]  ;;  %v1679_v9 = vld [vmem:[%s2501_s1 + $0x3f0] ss:$24 sps:$4 sm:$0xff]   ;;  %v55_v10 = vrot.slane %v36_v4, 7  ;;  %v197_v11 = vrot.slane %v40_v57, 1  ;;  %v198_v12 = vrot.slane %v41_v60, 1  ;;  %v176_v17 = vsel %vm51_vm2, %v174_v2, %v175_v1 }
  0x17   :  { %46 = vst.msk [vmem:[#allocation2 + $0x50] sm:$0xff] %vm42_vm4, %v37_v5  ;;  %v56_v7 = vrot.slane %v37_v5, 7  ;;  %v72_v8 = vrot.slane %v37_v5, 1  ;;  %v1682_v13 = vld [vmem:[%s2501_s1 + $0x424] ss:$24 sps:$4 sm:$0xff]   ;;  %vm146_vm9 = vcmask 260224  }
  0x18   :  { %202 = vrot.lane.b32.xlu1 %v195_v21, %s1835_s4  ;;  %1159 = vmatpush1.bf16.msra.mxu0 %v1667_v55  ;;  %v1648_v15 = vld [vmem:[%s2501_s1 + $0x1b0] ss:$24 sps:$4 sm:$0xff]   ;;  %65 = vst.msk [vmem:[#allocation2 + $0x30] sm:$0xfe] %vm62_vm5, %v55_v10  ;;  %v1650_v18 = vld [vmem:[%s2501_s1 + $0x1e4] ss:$24 sps:$4 sm:$0xff]   ;;  %v199_v20 = vsel %vm67_vm3, %v197_v11, %v198_v12 }
  0x19   :  { %1110 = vmatpush1.bf16.msra.mxu1 %v1634_v38  ;;  %1160 = vmatprep.subr.bf16.mxu0 %v1670_v58  ;;  %82 = vst.msk [vmem:[#allocation2 + $0x58] sm:$0x7f] %vm79_vm6, %v72_v8  ;;  %v73_v14 = vsel %vm67_vm3, %v71_v6, %v72_v8  ;;  %v57_v16 = vsel %vm51_vm2, %v55_v10, %v56_v7  ;;  %v1685_v19 = vld [vmem:[%s2501_s1 + $0x420] ss:$24 sps:$4 sm:$0xff]   ;;  %v1686_v21 = vld [vmem:[%s2501_s1 + $0x454] ss:$24 sps:$4 sm:$0xff]  }
  0x1a   :  { %91 = vrot.lane.b32.xlu0 %v38_v30, %s1834_s13  ;;  %1111 = vmatprep.subr.bf16.mxu1 %v1635_v45  ;;  %81 = vst.msk [vmem:[#allocation2 + $0x40] sm:$0xff] %vm42_vm4, %v73_v14  ;;  %66 = vst.msk [vmem:[#allocation2 + $0x48] sm:$0xff] %vm42_vm4, %v57_v16  ;;  %v1654_v22 = vld [vmem:[%s2501_s1 + $0x1e0] ss:$24 sps:$4 sm:$0xff]   ;;  %v1656_v23 = vld [vmem:[%s2501_s1 + $0x214] ss:$24 sps:$4 sm:$0xff]  }
  0x1b   :  { %v1691_v24 = vld [vmem:[%s2501_s1 + $0x450] ss:$24 sps:$4 sm:$0xff]   ;;  %v1697_v25 = vld [vmem:[%s2501_s1 + $0x14] ss:$24 sps:$4 sm:$0xff]   ;;  %v1662_v27 = vld [vmem:[%s2501_s1 + $0x244] ss:$24 sps:$4 sm:$0xff]  }
  0x1c   :  { %93 = vrot.lane.b32.xlu1 %v39_v35, %s1834_s13  ;;  %1161 = vmatpush1.bf16.msra.mxu0 %v1673_v62  ;;  %v1660_v26 = vld [vmem:[%s2501_s1 + $0x210] ss:$24 sps:$4 sm:$0xff]   ;;  %v1666_v28 = vld [vmem:[%s2501_s1 + $0x240] ss:$24 sps:$4 sm:$0xff]   ;;  %v1668_v29 = vld [vmem:[%s2501_s1 + $0x274] ss:$24 sps:$4 sm:$0xff]  }
  0x1d   :  { %1112 = vmatpush1.bf16.msra.mxu1 %v1637_v52  ;;  %1162 = vmatprep.subr.bf16.mxu0 %v1676_v0  ;;  %v1672_v30 = vld [vmem:[%s2501_s1 + $0x270] ss:$24 sps:$4 sm:$0xff]   ;;  %v1674_v31 = vld [vmem:[%s2501_s1 + $0x2a4] ss:$24 sps:$4 sm:$0xff]   ;;  %v1678_v32 = vld [vmem:[%s2501_s1 + $0x2a0] ss:$24 sps:$4 sm:$0xff]  }
  0x1e   :  { %114 = vrot.lane.b32.xlu0 %v107_v44, %s1834_s13  ;;  %1113 = vmatprep.subr.bf16.mxu1 %v1638_v54  ;;  %v1680_v33 = vld [vmem:[%s2501_s1 + $0x2d4] ss:$24 sps:$4 sm:$0xff]   ;;  %v1684_v34 = vld [vmem:[%s2501_s1 + $0x2d0] ss:$24 sps:$4 sm:$0xff]   ;;  %vm166_vm10 = vcmask 392448   ;;  %vm189_vm11 = vcmask 392449  }
  0x1f   :  { %v1690_v35 = vld [vmem:[%s2501_s1 + $0xc] ss:$24 sps:$4 sm:$0xff]   ;;  %vm213_vm12 = vcmask 391424   ;;  %v1688_v55 = vld [vmem:[%s2501_s1 + $0x8] ss:$24 sps:$4 sm:$0xff]  }
  0x20   :  { %116 = vrot.lane.b32.xlu1 %v109_v53, %s1834_s13  ;;  %1163 = vmatpush1.bf16.msra.mxu0 %v1679_v9  ;;  %v1694_v58 = vld [vmem:[%s2501_s1 + $0x3c] ss:$24 sps:$4 sm:$0xff]   ;;  %v1692_v62 = vld [vmem:[%s2501_s1 + $0x38] ss:$24 sps:$4 sm:$0xff]   ;;  %v1698_v6 = vld [vmem:[%s2501_s1 + $0x68] ss:$24 sps:$4 sm:$0xff]  }
  0x21   :  { %1114 = vmatpush1.bf16.msra.mxu1 %v1640_v59  ;;  %1164 = vmatprep.subr.bf16.mxu0 %v1682_v13  ;;  %v1701_v7 = vld [vmem:[%s2501_s1 + $0x40] ss:$24 sps:$4 sm:$0xff]   ;;  %v1706_v8 = vld [vmem:[%s2501_s1 + $0x9c] ss:$24 sps:$4 sm:$0xff]   ;;  %v1707_v13 = vld [vmem:[%s2501_s1 + $0x70] ss:$24 sps:$4 sm:$0xff]  }
  0x22   :  { %137 = vrot.lane.b32.xlu0 %v132_v56, %s1834_s13  ;;  %1115 = vmatprep.subr.bf16.mxu1 %v1641_v61  ;;  %v1709_v9 = vld [vmem:[%s2501_s1 + $0x74] ss:$24 sps:$4 sm:$0xff]  }
  0x23   :  { %v1712_v14 = vld [vmem:[%s2501_s1 + $0xcc] ss:$24 sps:$4 sm:$0xff]  }
  0x24   :  { %139 = vrot.lane.b32.xlu1 %v131_v50, %s1834_s13  ;;  %1165 = vmatpush1.bf16.msra.mxu0 %v1685_v19  ;;  %v1713_v19 = vld [vmem:[%s2501_s1 + $0xa0] ss:$24 sps:$4 sm:$0xff]  }
  0x25   :  { %1116 = vmatpush1.bf16.msra.mxu1 %v1643_v63  ;;  %1166 = vmatprep.subr.bf16.mxu0 %v1686_v21  ;;  %v1695_v63 = vld [vmem:[%s2501_s1 + $0x10] ss:$24 sps:$4 sm:$0xff]   ;;  %v1721_v21 = vld [vmem:[%s2501_s1 + $0xd4] ss:$24 sps:$4 sm:$0xff]  }
  0x26   :  { %158 = vrot.lane.b32.xlu0 %v40_v57, %s1835_s4  ;;  %1117 = vmatprep.subr.bf16.mxu1 %v1644_v3  ;;  %v1703_v3 = vld [vmem:[%s2501_s1 + $0x44] ss:$24 sps:$4 sm:$0xff]  }
  0x28   :  { %160 = vrot.lane.b32.xlu1 %v41_v60, %s1835_s4  ;;  %1167 = vmatpush1.bf16.msra.mxu0 %v1691_v24 }
  0x29   :  { %1118 = vmatpush1.bf16.msra.mxu1 %v1648_v15  ;;  %1311 = vmatprep.subr.bf16.mxu0 %v1697_v25  ;;  %v1715_v15 = vld [vmem:[%s2501_s1 + $0xa4] ss:$24 sps:$4 sm:$0xff]   ;;  %v1716_v25 = vld [vmem:[%s2501_s1 + $0xf8] ss:$24 sps:$4 sm:$0xff]  }
  0x2a   :  { %181 = vrot.lane.b32.xlu0 %v174_v2, %s1835_s4  ;;  %1119 = vmatprep.subr.bf16.mxu1 %v1650_v18  ;;  %v1700_v2 = vld [vmem:[%s2501_s1 + $0x6c] ss:$24 sps:$4 sm:$0xff]   ;;  %v1710_v18 = vld [vmem:[%s2501_s1 + $0xc8] ss:$24 sps:$4 sm:$0xff]  }
  0x2c   :  { %183 = vrot.lane.b32.xlu1 %v176_v17, %s1835_s4 }
  0x2d   :  { %1120 = vmatpush1.bf16.msra.mxu1 %v1654_v22 }
  0x2e   :  { %204 = vrot.lane.b32.xlu0 %v199_v20, %s1835_s4  ;;  %1121 = vmatprep.subr.bf16.mxu1 %v1656_v23  ;;  %v1718_v20 = vld [vmem:[%s2501_s1 + $0xfc] ss:$24 sps:$4 sm:$0xff]  }
  0x30   :  { %206 = vrot.lane.b32.xlu1 %v198_v12, %s1835_s4  ;;  %v1704_v12 = vld [vmem:[%s2501_s1 + $0x98] ss:$24 sps:$4 sm:$0xff]  }
  0x31   :  { %1122 = vmatpush1.bf16.msra.mxu1 %v1660_v26  ;;  %v1719_v26 = vld [vmem:[%s2501_s1 + $0xd0] ss:$24 sps:$4 sm:$0xff]  }
  0x32   :  { %1123 = vmatprep.subr.bf16.mxu1 %v1662_v27 }
  0x35   :  { %1124 = vmatpush1.bf16.msra.mxu1 %v1666_v28 }
  0x36   :  { %1125 = vmatprep.subr.bf16.mxu1 %v1668_v29  ;;  %v1724_v29 = vld [vmem:[%s2501_s1 + $0x12c] ss:$24 sps:$4 sm:$0xff]  }
  0x39   :  { %1126 = vmatpush1.bf16.msra.mxu1 %v1672_v30  ;;  %v1727_v30 = vld [vmem:[%s2501_s1 + $0x104] ss:$24 sps:$4 sm:$0xff]  }
  0x3a   :  { %1127 = vmatprep.subr.bf16.mxu1 %v1674_v31 }
  0x3d   :  { %1128 = vmatpush1.bf16.msra.mxu1 %v1678_v32  ;;  %v1722_v32 = vld [vmem:[%s2501_s1 + $0x128] ss:$24 sps:$4 sm:$0xff]  }
  0x3e   :  { %1129 = vmatprep.subr.bf16.mxu1 %v1680_v33  ;;  %v1725_v33 = vld [vmem:[%s2501_s1 + $0x100] ss:$24 sps:$4 sm:$0xff]  }
  0x41   :  { %1130 = vmatpush1.bf16.msra.mxu1 %v1684_v34 }
  0x42   :  { %1205 = vmatprep.subr.bf16.mxu1 %v1690_v35 }
  0x74   :  { %v88_v36 = vpop.permute.xlu0 %87 }
  0x75   :  { %100 = vst.msk [vmem:[#allocation2 + $0x8] sm:$0xff] %vm99_vm7, %v88_v36  ;;  %v1730_v36 = vld [vmem:[%s2501_s1 + $0x15c] ss:$24 sps:$4 sm:$0xff]  }
  0x76   :  { %v111_v37 = vpop.permute.xlu1 %110 }
  0x77   :  { %123 = vst.msk [vmem:[#allocation2] sm:$0xfe] %vm122_vm8, %v111_v37  ;;  %v1733_v37 = vld [vmem:[%s2501_s1 + $0x134] ss:$24 sps:$4 sm:$0xff]  }
  0x78   :  { %v90_v38 = vpop.permute.xlu0 %89 }
  0x79   :  { %101 = vst.msk [vmem:[#allocation2 + $0x20] sm:$0xff] %vm99_vm7, %v90_v38 }
  0x7a   :  { %v113_v39 = vpop.permute.xlu1 %112 }
  0x7b   :  { %124 = vst.msk [vmem:[#allocation2 + $0x18] sm:$0xff] %vm99_vm7, %v113_v39  ;;  %v1728_v39 = vld [vmem:[%s2501_s1 + $0x158] ss:$24 sps:$4 sm:$0xff]  }
  0x7c   :  { %v134_v40 = vpop.permute.xlu0 %133 }
  0x7d   :  { %145 = vst.msk [vmem:[#allocation2 + $0x10] sm:$0xff] %vm99_vm7, %v134_v40  ;;  %v1731_v40 = vld [vmem:[%s2501_s1 + $0x130] ss:$24 sps:$4 sm:$0xff]  }
  0x7e   :  { %v136_v42 = vpop.permute.xlu1 %135 }
  0x7f   :  { %147 = vst.msk [vmem:[#allocation2 + $0x28] sm:$0x7f] %vm146_vm9, %v136_v42 }
  0x80   :  { %v155_v43 = vpop.permute.xlu0 %154 }
  0x81   :  { %167 = vst.msk [vmem:[#allocation2 + $0x8] sm:$0xff] %vm166_vm10, %v155_v43 }
  0x82   :  { %v157_v44 = vpop.permute.xlu1 %156 }
  0x83   :  { %168 = vst.msk [vmem:[#allocation2 + $0x20] sm:$0xff] %vm166_vm10, %v157_v44  ;;  %v1736_v44 = vld [vmem:[%s2501_s1 + $0x18c] ss:$24 sps:$4 sm:$0xff]  }
  0x84   :  { %v178_v45 = vpop.permute.xlu0 %177 }
  0x85   :  { %190 = vst.msk [vmem:[#allocation2] sm:$0xfe] %vm189_vm11, %v178_v45  ;;  %v1739_v45 = vld [vmem:[%s2501_s1 + $0x164] ss:$24 sps:$4 sm:$0xff]  }
  0x86   :  { %v180_v46 = vpop.permute.xlu1 %179 }
  0x87   :  { %191 = vst.msk [vmem:[#allocation2 + $0x18] sm:$0xff] %vm166_vm10, %v180_v46  ;;  %v1734_v46 = vld [vmem:[%s2501_s1 + $0x188] ss:$24 sps:$4 sm:$0xff]  }
  0x88   :  { %v201_v47 = vpop.permute.xlu0 %200  ;;  %v218_v48 = vld [vmem:[#allocation2 + $0x8] sm:$0xff] }
  0x89   :  { %212 = vst.msk [vmem:[#allocation2 + $0x10] sm:$0xff] %vm166_vm10, %v201_v47  ;;  %v1737_v47 = vld [vmem:[%s2501_s1 + $0x160] ss:$24 sps:$4 sm:$0xff]  }
  0x8a   :  { %v203_v49 = vpop.permute.xlu1 %202  ;;  %v221_v50 = vld [vmem:[#allocation2 + $0x20] sm:$0xff] }
  0x8b   :  { %214 = vst.msk [vmem:[#allocation2 + $0x28] sm:$0x7f] %vm213_vm12, %v203_v49  ;;  %v2099_v51 = vpack.c.bf16 %v221_v50, %v218_v48  ;;  %v1742_v48 = vld [vmem:[%s2501_s1 + $0x1bc] ss:$24 sps:$4 sm:$0xff]   ;;  %v1740_v50 = vld [vmem:[%s2501_s1 + $0x1b8] ss:$24 sps:$4 sm:$0xff]  }
  0x8c   :  { %v92_v52 = vpop.permute.xlu0 %91  ;;  %v217_v53 = vld [vmem:[#allocation2] sm:$0xff]  ;;  %v1745_v49 = vld [vmem:[%s2501_s1 + $0x194] ss:$24 sps:$4 sm:$0xff]  }
  0x8d   :  { %1131 = vmatprep.mubr.bf16.mxu1 %v2099_v51  ;;  %102 = vst.msk [vmem:[#allocation2 + $0x38] sm:$0xff] %vm99_vm7, %v92_v52  ;;  %v1748_v52 = vld [vmem:[%s2501_s1 + $0x1ec] ss:$24 sps:$4 sm:$0xff]  }
  0x8e   :  { %v94_v54 = vpop.permute.xlu1 %93  ;;  %v220_v56 = vld [vmem:[#allocation2 + $0x18] sm:$0xff] }
  0x8f   :  { %103 = vst.msk [vmem:[#allocation2 + $0x50] sm:$0xff] %vm99_vm7, %v94_v54  ;;  %v2107_v57 = vpack.c.bf16 %v220_v56, %v217_v53  ;;  %v1751_v53 = vld [vmem:[%s2501_s1 + $0x1c4] ss:$24 sps:$4 sm:$0xff]   ;;  %v1746_v54 = vld [vmem:[%s2501_s1 + $0x1e8] ss:$24 sps:$4 sm:$0xff]  }
  0x90   :  { %v115_v59 = vpop.permute.xlu0 %114  ;;  %v219_v60 = vld [vmem:[#allocation2 + $0x10] sm:$0xff] }
  0x91   :  { %1132 = vmatmul.mubr.bf16.vlgmr.msra.gmra.mrb[0].mxu1 %v2107_v57  ;;  %125 = vst.msk [vmem:[#allocation2 + $0x30] sm:$0xfe] %vm122_vm8, %v115_v59  ;;  %v1754_v56 = vld [vmem:[%s2501_s1 + $0x21c] ss:$24 sps:$4 sm:$0xff]   ;;  %v1752_v59 = vld [vmem:[%s2501_s1 + $0x218] ss:$24 sps:$4 sm:$0xff]  }
  0x92   :  { %1206 = vmatpush1.bf16.msra.mxu1 %v1688_v55  ;;  %v117_v61 = vpop.permute.xlu1 %116  ;;  %v222_v0 = vld [vmem:[#allocation2 + $0x28] sm:$0xff]  ;;  %v1749_v55 = vld [vmem:[%s2501_s1 + $0x1c0] ss:$24 sps:$4 sm:$0xff]  }
  0x93   :  { %126 = vst.msk [vmem:[#allocation2 + $0x48] sm:$0xff] %vm99_vm7, %v117_v61  ;;  %1207 = vmatprep.subr.bf16.mxu1 %v1694_v58  ;;  %v2121_v1 = vpack.c.bf16 %v222_v0, %v219_v60  ;;  %v1757_v58 = vld [vmem:[%s2501_s1 + $0x1f4] ss:$24 sps:$4 sm:$0xff]   ;;  %v1755_v60 = vld [vmem:[%s2501_s1 + $0x1f0] ss:$24 sps:$4 sm:$0xff]  }
  0x94   :  { %v138_v4 = vpop.permute.xlu0 %137  ;;  %v1760_v61 = vld [vmem:[%s2501_s1 + $0x24c] ss:$24 sps:$4 sm:$0xff]   ;;  %v1761_v0 = vld [vmem:[%s2501_s1 + $0x220] ss:$24 sps:$4 sm:$0xff]  }
  0x95   :  { %1185 = vmatmul.mubr.bf16.vlgmr.msra.gmra.mrb[0].mxu0 %v2121_v1  ;;  %148 = vst.msk [vmem:[#allocation2 + $0x40] sm:$0xff] %vm99_vm7, %v138_v4  ;;  %v1764_v4 = vld [vmem:[%s2501_s1 + $0x278] ss:$24 sps:$4 sm:$0xff]  }
  0x96   :  { %1208 = vmatpush1.bf16.msra.mxu1 %v1692_v62  ;;  %1312 = vmatpush1.bf16.msra.mxu0 %v1695_v63  ;;  %v140_v5 = vpop.permute.xlu1 %139  ;;  %v1763_v62 = vld [vmem:[%s2501_s1 + $0x224] ss:$24 sps:$4 sm:$0xff]   ;;  %v1758_v63 = vld [vmem:[%s2501_s1 + $0x248] ss:$24 sps:$4 sm:$0xff]  }
  0x97   :  { %149 = vst.msk [vmem:[#allocation2 + $0x58] sm:$0x7f] %vm146_vm9, %v140_v5  ;;  %1209 = vmatprep.subr.bf16.mxu1 %v1700_v2  ;;  %1313 = vmatprep.subr.bf16.mxu0 %v1703_v3  ;;  %v1766_v2 = vld [vmem:[%s2501_s1 + $0x27c] ss:$24 sps:$4 sm:$0xff]   ;;  %v1767_v5 = vld [vmem:[%s2501_s1 + $0x250] ss:$24 sps:$4 sm:$0xff]  }
  0x98   :  { %v159_v10 = vpop.permute.xlu0 %158  ;;  %1194 = vmatprep.mubr.bf16.mxu0 %v1836_v41  ;;  %v1769_v3 = vld [vmem:[%s2501_s1 + $0x254] ss:$24 sps:$4 sm:$0xff]  }
  0x99   :  { %169 = vst.msk [vmem:[#allocation2 + $0x38] sm:$0xff] %vm166_vm10, %v159_v10  ;;  %v1778_v10 = vld [vmem:[%s2501_s1 + $0x2dc] ss:$24 sps:$4 sm:$0xff]  }
  0x9a   :  { %1210 = vmatpush1.bf16.msra.mxu1 %v1698_v6  ;;  %1314 = vmatpush1.bf16.msra.mxu0 %v1701_v7  ;;  %v161_v11 = vpop.permute.xlu1 %160  ;;  %v1772_v6 = vld [vmem:[%s2501_s1 + $0x2ac] ss:$24 sps:$4 sm:$0xff]  }
  0x9b   :  { %170 = vst.msk [vmem:[#allocation2 + $0x50] sm:$0xff] %vm166_vm10, %v161_v11  ;;  %1211 = vmatprep.subr.bf16.mxu1 %v1706_v8  ;;  %1315 = vmatprep.subr.bf16.mxu0 %v1709_v9  ;;  %v1775_v7 = vld [vmem:[%s2501_s1 + $0x284] ss:$24 sps:$4 sm:$0xff]   ;;  %v1770_v8 = vld [vmem:[%s2501_s1 + $0x2a8] ss:$24 sps:$4 sm:$0xff]  }
  0x9c   :  { %v182_v16 = vpop.permute.xlu0 %181  ;;  %v1773_v9 = vld [vmem:[%s2501_s1 + $0x280] ss:$24 sps:$4 sm:$0xff]   ;;  %v1781_v11 = vld [vmem:[%s2501_s1 + $0x2b4] ss:$24 sps:$4 sm:$0xff]  }
  0x9d   :  { %192 = vst.msk [vmem:[#allocation2 + $0x30] sm:$0xfe] %vm189_vm11, %v182_v16  ;;  %v1782_v16 = vld [vmem:[%s2501_s1 + $0x308] ss:$24 sps:$4 sm:$0xff]  }
  0x9e   :  { %1212 = vmatpush1.bf16.msra.mxu1 %v1704_v12  ;;  %1316 = vmatpush1.bf16.msra.mxu0 %v1707_v13  ;;  %v184_v17 = vpop.permute.xlu1 %183  ;;  %v1776_v12 = vld [vmem:[%s2501_s1 + $0x2d8] ss:$24 sps:$4 sm:$0xff]  }
  0x9f   :  { %193 = vst.msk [vmem:[#allocation2 + $0x48] sm:$0xff] %vm166_vm10, %v184_v17  ;;  %1213 = vmatprep.subr.bf16.mxu1 %v1712_v14  ;;  %1317 = vmatprep.subr.bf16.mxu0 %v1715_v15  ;;  %v1779_v13 = vld [vmem:[%s2501_s1 + $0x2b0] ss:$24 sps:$4 sm:$0xff]   ;;  %v1784_v14 = vld [vmem:[%s2501_s1 + $0x30c] ss:$24 sps:$4 sm:$0xff]  }
  0xa0   :  { %v205_v22 = vpop.permute.xlu0 %204  ;;  %v224_v23 = vld [vmem:[#allocation2 + $0x38] sm:$0xff] }
  0xa1   :  { %215 = vst.msk [vmem:[#allocation2 + $0x40] sm:$0xff] %vm166_vm10, %v205_v22  ;;  %v1787_v15 = vld [vmem:[%s2501_s1 + $0x2e4] ss:$24 sps:$4 sm:$0xff]   ;;  %v1785_v17 = vld [vmem:[%s2501_s1 + $0x2e0] ss:$24 sps:$4 sm:$0xff]  }
  0xa2   :  { %1214 = vmatpush1.bf16.msra.mxu1 %v1710_v18  ;;  %1318 = vmatpush1.bf16.msra.mxu0 %v1713_v19  ;;  %v207_v24 = vpop.permute.xlu1 %206  ;;  %v227_v27 = vld [vmem:[#allocation2 + $0x50] sm:$0xff]  ;;  %v1796_v22 = vld [vmem:[%s2501_s1 + $0x36c] ss:$24 sps:$4 sm:$0xff]  }
  0xa3   :  { %216 = vst.msk [vmem:[#allocation2 + $0x58] sm:$0x7f] %vm213_vm12, %v207_v24  ;;  %1215 = vmatprep.subr.bf16.mxu1 %v1718_v20  ;;  %1319 = vmatprep.subr.bf16.mxu0 %v1721_v21  ;;  %v2181_v28 = vpack.c.bf16 %v227_v27, %v224_v23  ;;  %v1790_v18 = vld [vmem:[%s2501_s1 + $0x33c] ss:$24 sps:$4 sm:$0xff]   ;;  %v1788_v20 = vld [vmem:[%s2501_s1 + $0x338] ss:$24 sps:$4 sm:$0xff]  }
  0xa4   :  { %v223_v31 = vld [vmem:[#allocation2 + $0x30] sm:$0xff]  ;;  %v1799_v23 = vld [vmem:[%s2501_s1 + $0x344] ss:$24 sps:$4 sm:$0xff]   ;;  %v1794_v24 = vld [vmem:[%s2501_s1 + $0x368] ss:$24 sps:$4 sm:$0xff]  }
  0xa5   :  { %1141 = vmatprep.mubr.bf16.mxu1 %v2181_v28  ;;  %v1793_v19 = vld [vmem:[%s2501_s1 + $0x314] ss:$24 sps:$4 sm:$0xff]   ;;  %v1791_v21 = vld [vmem:[%s2501_s1 + $0x310] ss:$24 sps:$4 sm:$0xff]  }
  0xa6   :  { %1216 = vmatpush1.bf16.msra.mxu1 %v1716_v25  ;;  %1320 = vmatpush1.bf16.msra.mxu0 %v1719_v26  ;;  %v226_v34 = vld [vmem:[#allocation2 + $0x48] sm:$0xff]  ;;  %v1797_v25 = vld [vmem:[%s2501_s1 + $0x340] ss:$24 sps:$4 sm:$0xff]   ;;  %v1802_v26 = vld [vmem:[%s2501_s1 + $0x39c] ss:$24 sps:$4 sm:$0xff]  }
  0xa7   :  { %1217 = vmatprep.subr.bf16.mxu1 %v1724_v29  ;;  %1321 = vmatprep.subr.bf16.mxu0 %v1727_v30  ;;  %v2196_v35 = vpack.c.bf16 %v226_v34, %v223_v31  ;;  %v1800_v27 = vld [vmem:[%s2501_s1 + $0x398] ss:$24 sps:$4 sm:$0xff]   ;;  %v1808_v29 = vld [vmem:[%s2501_s1 + $0x3cc] ss:$24 sps:$4 sm:$0xff]   ;;  %v1806_v31 = vld [vmem:[%s2501_s1 + $0x3c8] ss:$24 sps:$4 sm:$0xff]  }
  0xa8   :  { %v225_v38 = vld [vmem:[#allocation2 + $0x40] sm:$0xff]  ;;  %v1817_v34 = vld [vmem:[%s2501_s1 + $0x3d4] ss:$24 sps:$4 sm:$0xff]  }
  0xa9   :  { %1142 = vmatmul.mubr.bf16.gmra.mrb[4].mxu1 %v2196_v35  ;;  %v1811_v30 = vld [vmem:[%s2501_s1 + $0x3a4] ss:$24 sps:$4 sm:$0xff]  }
  0xaa   :  { %1218 = vmatpush1.bf16.msra.mxu1 %v1722_v32  ;;  %1322 = vmatpush1.bf16.msra.mxu0 %v1725_v33  ;;  %v228_v42 = vld [vmem:[#allocation2 + $0x58] sm:$0xff] }
  0xab   :  { %1237 = vmatprep.mubr.bf16.mxu1 %v2099_v51  ;;  %1219 = vmatprep.subr.bf16.mxu1 %v1730_v36  ;;  %v2212_v43 = vpack.c.bf16 %v228_v42, %v225_v38  ;;  %v1809_v32 = vld [vmem:[%s2501_s1 + $0x3a0] ss:$24 sps:$4 sm:$0xff]   ;;  %v1814_v33 = vld [vmem:[%s2501_s1 + $0x3fc] ss:$24 sps:$4 sm:$0xff]   ;;  %v1815_v36 = vld [vmem:[%s2501_s1 + $0x3d0] ss:$24 sps:$4 sm:$0xff]  }
  0xac   :  { %1323 = vmatprep.subr.bf16.mxu0 %v1733_v37  ;;  %v1820_v37 = vld [vmem:[%s2501_s1 + $0x42c] ss:$24 sps:$4 sm:$0xff]   ;;  %v1826_v42 = vld [vmem:[%s2501_s1 + $0x45c] ss:$24 sps:$4 sm:$0xff]  }
  0xad   :  { %1195 = vmatmul.mubr.bf16.gmra.mrb[4].mxu0 %v2212_v43  ;;  %v1823_v38 = vld [vmem:[%s2501_s1 + $0x404] ss:$24 sps:$4 sm:$0xff]  }
  0xae   :  { %1220 = vmatpush1.bf16.msra.mxu1 %v1728_v39  ;;  %1324 = vmatpush1.bf16.msra.mxu0 %v1731_v40  ;;  %v1818_v39 = vld [vmem:[%s2501_s1 + $0x428] ss:$24 sps:$4 sm:$0xff]  }
  0xaf   :  { %1343 = vmatprep.mubr.bf16.mxu0 %v2099_v51  ;;  %1221 = vmatprep.subr.bf16.mxu1 %v1736_v44  ;;  %v1743_v51 = vld [vmem:[%s2501_s1 + $0x190] ss:$24 sps:$4 sm:$0xff]   ;;  %v1821_v40 = vld [vmem:[%s2501_s1 + $0x400] ss:$24 sps:$4 sm:$0xff]   ;;  %v1829_v44 = vld [vmem:[%s2501_s1 + $0x434] ss:$24 sps:$4 sm:$0xff]  }
  0xb0   :  { %1325 = vmatprep.subr.bf16.mxu0 %v1739_v45  ;;  %v1824_v45 = vld [vmem:[%s2501_s1 + $0x458] ss:$24 sps:$4 sm:$0xff]  }
  0xb2   :  { %1222 = vmatpush1.bf16.msra.mxu1 %v1734_v46  ;;  %1326 = vmatpush1.bf16.msra.mxu0 %v1737_v47  ;;  %v1827_v46 = vld [vmem:[%s2501_s1 + $0x430] ss:$24 sps:$4 sm:$0xff]   ;;  %v1832_v47 = vld [vmem:[%s2501_s1 + $0x464] ss:$24 sps:$4 sm:$0xff]  }
  0xb3   :  { %1223 = vmatprep.subr.bf16.mxu1 %v1742_v48  ;;  %1327 = vmatprep.subr.bf16.mxu0 %v1745_v49  ;;  %v1830_v48 = vld [vmem:[%s2501_s1 + $0x460] ss:$24 sps:$4 sm:$0xff]  }
  0xb6   :  { %1224 = vmatpush1.bf16.msra.mxu1 %v1740_v50  ;;  %1328 = vmatpush1.bf16.msra.mxu0 %v1743_v51 }
  0xb7   :  { %1225 = vmatprep.subr.bf16.mxu1 %v1748_v52  ;;  %1329 = vmatprep.subr.bf16.mxu0 %v1751_v53 }
  0xba   :  { %1226 = vmatpush1.bf16.msra.mxu1 %v1746_v54  ;;  %1330 = vmatpush1.bf16.msra.mxu0 %v1749_v55 }
  0xbb   :  { %1227 = vmatprep.subr.bf16.mxu1 %v1754_v56  ;;  %1331 = vmatprep.subr.bf16.mxu0 %v1757_v58 }
  0xbe   :  { %1228 = vmatpush1.bf16.msra.mxu1 %v1752_v59  ;;  %1332 = vmatpush1.bf16.msra.mxu0 %v1755_v60 }
  0xbf   :  { %1229 = vmatprep.subr.bf16.mxu1 %v1760_v61  ;;  %1333 = vmatprep.subr.bf16.mxu0 %v1763_v62 }
  0xc2   :  { %1230 = vmatpush1.bf16.msra.mxu1 %v1758_v63  ;;  %1334 = vmatpush1.bf16.msra.mxu0 %v1761_v0 }
  0xc3   :  { %1231 = vmatprep.subr.bf16.mxu1 %v1766_v2  ;;  %1335 = vmatprep.subr.bf16.mxu0 %v1769_v3 }
  0xc6   :  { %1232 = vmatpush1.bf16.msra.mxu1 %v1764_v4  ;;  %1336 = vmatpush1.bf16.msra.mxu0 %v1767_v5 }
  0xc7   :  { %1233 = vmatprep.subr.bf16.mxu1 %v1772_v6  ;;  %1337 = vmatprep.subr.bf16.mxu0 %v1775_v7 }
  0xca   :  { %1234 = vmatpush1.bf16.msra.mxu1 %v1770_v8  ;;  %1338 = vmatpush1.bf16.msra.mxu0 %v1773_v9 }
  0xcb   :  { %1235 = vmatprep.subr.bf16.mxu1 %v1778_v10  ;;  %1339 = vmatprep.subr.bf16.mxu0 %v1781_v11 }
  0xce   :  { %1236 = vmatpush1.bf16.msra.mxu1 %v1776_v12  ;;  %1340 = vmatpush1.bf16.msra.mxu0 %v1779_v13 }
  0xcf   :  { %1258 = vmatprep.subr.bf16.mxu1 %v1784_v14  ;;  %1341 = vmatprep.subr.bf16.mxu0 %v1787_v15 }
  0xd1   :  { %1238 = vmatmul.mubr.bf16.vlgmr.msra.gmra.mrb[8].mxu1 %v2107_v57 }
  0xd2   :  { %1247 = vmatprep.mubr.bf16.mxu1 %v2181_v28  ;;  %1259 = vmatpush1.bf16.msra.mxu1 %v1782_v16 }
  0xd3   :  { %1342 = vmatpush1.bf16.msra.mxu0 %v1785_v17  ;;  %1260 = vmatprep.subr.bf16.mxu1 %v1790_v18 }
  0xd4   :  { %1364 = vmatprep.subr.bf16.mxu0 %v1793_v19 }
  0xd6   :  { %1344 = vmatmul.mubr.bf16.vlgmr.msra.gmra.mrb[8].mxu0 %v2107_v57  ;;  %1261 = vmatpush1.bf16.msra.mxu1 %v1788_v20  ;;  %v1805_v57 = vld [vmem:[%s2501_s1 + $0x374] ss:$24 sps:$4 sm:$0xff]  }
  0xd7   :  { %1353 = vmatprep.mubr.bf16.mxu0 %v2181_v28  ;;  %1365 = vmatpush1.bf16.msra.mxu0 %v1791_v21  ;;  %v1803_v28 = vld [vmem:[%s2501_s1 + $0x370] ss:$24 sps:$4 sm:$0xff]  }
  0xd8   :  { %1262 = vmatprep.subr.bf16.mxu1 %v1796_v22  ;;  %1366 = vmatprep.subr.bf16.mxu0 %v1799_v23 }
  0xd9   :  { %1248 = vmatmul.mubr.bf16.gmra.mrb[12].mxu1 %v2196_v35 }
  0xda   :  { %1263 = vmatpush1.bf16.msra.mxu1 %v1794_v24  ;;  %1290 = vmatprep.mubr.bf16.mxu1 %v1836_v41 }
  0xdb   :  { %1367 = vmatpush1.bf16.msra.mxu0 %v1797_v25  ;;  %1264 = vmatprep.subr.bf16.mxu1 %v1802_v26 }
  0xdc   :  { %1368 = vmatprep.subr.bf16.mxu0 %v1805_v57 }
  0xde   :  { %1354 = vmatmul.mubr.bf16.gmra.mrb[12].mxu0 %v2196_v35  ;;  %1265 = vmatpush1.bf16.msra.mxu1 %v1800_v27  ;;  %v1812_v35 = vld [vmem:[%s2501_s1 + $0x3f8] ss:$24 sps:$4 sm:$0xff]  }
  0xdf   :  { %1369 = vmatpush1.bf16.msra.mxu0 %v1803_v28  ;;  %1266 = vmatprep.subr.bf16.mxu1 %v1808_v29 }
  0xe0   :  { %1370 = vmatprep.subr.bf16.mxu0 %v1811_v30  ;;  %1396 = vmatprep.mubr.bf16.mxu0 %v1836_v41 }
  0xe2   :  { %1267 = vmatpush1.bf16.msra.mxu1 %v1806_v31 }
  0xe3   :  { %1371 = vmatpush1.bf16.msra.mxu0 %v1809_v32  ;;  %1268 = vmatprep.subr.bf16.mxu1 %v1814_v33 }
  0xe4   :  { %1372 = vmatprep.subr.bf16.mxu0 %v1817_v34 }
  0xe6   :  { %1269 = vmatpush1.bf16.msra.mxu1 %v1812_v35 }
  0xe7   :  { %1373 = vmatpush1.bf16.msra.mxu0 %v1815_v36  ;;  %1270 = vmatprep.subr.bf16.mxu1 %v1820_v37 }
  0xe8   :  { %1374 = vmatprep.subr.bf16.mxu0 %v1823_v38 }
  0xea   :  { %1271 = vmatpush1.bf16.msra.mxu1 %v1818_v39 }
  0xeb   :  { %1375 = vmatpush1.bf16.msra.mxu0 %v1821_v40  ;;  %1272 = vmatprep.subr.bf16.mxu1 %v1826_v42 }
  0xec   :  { %1376 = vmatprep.subr.bf16.mxu0 %v1829_v44 }
  0xee   :  { %1273 = vmatpush1.bf16.msra.mxu1 %v1824_v45 }
  0xef   :  { %1377 = vmatpush1.bf16.msra.mxu0 %v1827_v46 }
  0xf0   :  { %1378 = vmatprep.subr.bf16.mxu0 %v1832_v47 }
  0xf1   :  { %1291 = vmatmul.mubr.bf16.vlgmr.msra.gmra.mrb[8].mxu1 %v2121_v1 }
  0xf2   :  { %1300 = vmatprep.mubr.bf16.mxu1 %v1836_v41 }
  0xf3   :  { %1379 = vmatpush1.bf16.msra.mxu0 %v1830_v48 }
  0xf6   :  { %1397 = vmatmul.mubr.bf16.vlgmr.msra.gmra.mrb[8].mxu0 %v2121_v1 }
  0xf7   :  { %1406 = vmatprep.mubr.bf16.mxu0 %v1836_v41 }
  0xf9   :  { %1301 = vmatmul.mubr.bf16.gmra.mrb[12].mxu1 %v2212_v43 }
  0xfe   :  { %1407 = vmatmul.mubr.bf16.gmra.mrb[12].mxu0 %v2212_v43 }
 0x164   :  { %v1133_v49 = vpop.f32.mrb[0].mxu1 }
 0x165   :  { %v1135_v50 = vpop.f32.mrb[1].mxu1 }
 0x166   :  { %v1137_v51 = vpop.f32.mrb[2].mxu1 }
 0x167   :  { %v1139_v52 = vpop.f32.mrb[3].mxu1 }
 0x168   :  { %v1186_v53 = vpop.f32.mrb[0].mxu0 }
 0x169   :  { %v1187_v54 = vadd.f32 %v1186_v53, %v1133_v49  ;;  %v1188_v55 = vpop.f32.mrb[1].mxu0 }
 0x16a   :  { %v1189_v56 = vadd.f32 %v1188_v55, %v1135_v50  ;;  %v1190_v58 = vpop.f32.mrb[2].mxu0 }
 0x16b   :  { %1417 = vst [vmem:[%s2502_s2] sm:$0xff] %v1187_v54  ;;  %v1191_v1 = vadd.f32 %v1190_v58, %v1137_v51  ;;  %v1192_v59 = vpop.f32.mrb[3].mxu0 }
 0x16c   :  { %1418 = vst [vmem:[%s2502_s2 + $0x8] sm:$0xff] %v1189_v56  ;;  %v1193_v41 = vadd.f32 %v1192_v59, %v1139_v52 }
 0x16d   :  { %1423 = vst [vmem:[%s2502_s2 + $0x30] sm:$0xff] %v1191_v1 }
 0x16e   :  { %1424 = vst [vmem:[%s2502_s2 + $0x38] sm:$0xff] %v1193_v41 }
 0x17c   :  { %v1143_v43 = vpop.f32.mrb[4].mxu1 }
 0x17d   :  { %v1145_v60 = vpop.f32.mrb[5].mxu1 }
 0x17e   :  { %v1147_v61 = vpop.f32.mrb[6].mxu1 }
 0x17f   :  { %v1149_v62 = vpop.f32.mrb[7].mxu1 }
 0x180   :  { %v1196_v63 = vpop.f32.mrb[4].mxu0 }
 0x181   :  { %v1197_v0 = vadd.f32 %v1196_v63, %v1143_v43  ;;  %v1198_v2 = vpop.f32.mrb[5].mxu0 }
 0x182   :  { %v1199_v3 = vadd.f32 %v1198_v2, %v1145_v60  ;;  %v1200_v4 = vpop.f32.mrb[6].mxu0 }
 0x183   :  { %1429 = vst [vmem:[%s2502_s2 + $0x60] sm:$0xff] %v1197_v0  ;;  %v1201_v5 = vadd.f32 %v1200_v4, %v1147_v61  ;;  %v1202_v6 = vpop.f32.mrb[7].mxu0 }
 0x184   :  { %1430 = vst [vmem:[%s2502_s2 + $0x68] sm:$0xff] %v1199_v3  ;;  %v1203_v7 = vadd.f32 %v1202_v6, %v1149_v62 }
 0x185   :  { %1435 = vst [vmem:[%s2502_s2 + $0x90] sm:$0xff] %v1201_v5 }
 0x186   :  { %1436 = vst [vmem:[%s2502_s2 + $0x98] sm:$0xff] %v1203_v7 }
 0x1c4   :  { %v1292_v8 = vpop.f32.mrb[8].mxu1 }
 0x1c5   :  { %1419 = vst [vmem:[%s2502_s2 + $0x10] sm:$0xff] %v1292_v8  ;;  %v1294_v9 = vpop.f32.mrb[9].mxu1 }
 0x1c6   :  { %1420 = vst [vmem:[%s2502_s2 + $0x18] sm:$0xff] %v1294_v9  ;;  %v1296_v10 = vpop.f32.mrb[10].mxu1 }
 0x1c7   :  { %1425 = vst [vmem:[%s2502_s2 + $0x40] sm:$0xff] %v1296_v10  ;;  %v1298_v11 = vpop.f32.mrb[11].mxu1 }
 0x1c8   :  { %1426 = vst [vmem:[%s2502_s2 + $0x48] sm:$0xff] %v1298_v11 }
 0x1c9   :  { %v1398_v12 = vpop.f32.mrb[8].mxu0 }
 0x1ca   :  { %1421 = vst [vmem:[%s2502_s2 + $0x20] sm:$0xff] %v1398_v12  ;;  %v1400_v13 = vpop.f32.mrb[9].mxu0 }
 0x1cb   :  { %1422 = vst [vmem:[%s2502_s2 + $0x28] sm:$0xff] %v1400_v13  ;;  %v1402_v14 = vpop.f32.mrb[10].mxu0 }
 0x1cc   :  { %1427 = vst [vmem:[%s2502_s2 + $0x50] sm:$0xff] %v1402_v14  ;;  %v1404_v15 = vpop.f32.mrb[11].mxu0  ;;  %v1302_v16 = vpop.f32.mrb[12].mxu1 }
 0x1cd   :  { %1428 = vst [vmem:[%s2502_s2 + $0x58] sm:$0xff] %v1404_v15  ;;  %1431 = vst [vmem:[%s2502_s2 + $0x70] sm:$0xff] %v1302_v16  ;;  %v1304_v17 = vpop.f32.mrb[13].mxu1 }
 0x1ce   :  { %1432 = vst [vmem:[%s2502_s2 + $0x78] sm:$0xff] %v1304_v17  ;;  %v1306_v18 = vpop.f32.mrb[14].mxu1 }
 0x1cf   :  { %1437 = vst [vmem:[%s2502_s2 + $0xa0] sm:$0xff] %v1306_v18  ;;  %v1308_v19 = vpop.f32.mrb[15].mxu1 }
 0x1d0   :  { %1438 = vst [vmem:[%s2502_s2 + $0xa8] sm:$0xff] %v1308_v19 }
 0x1d1   :  { %v1408_v20 = vpop.f32.mrb[12].mxu0 }
 0x1d2   :  { %1433 = vst [vmem:[%s2502_s2 + $0x80] sm:$0xff] %v1408_v20  ;;  %v1410_v21 = vpop.f32.mrb[13].mxu0 }
 0x1d3   :  { %1434 = vst [vmem:[%s2502_s2 + $0x88] sm:$0xff] %v1410_v21  ;;  %v1412_v22 = vpop.f32.mrb[14].mxu0 }
 0x1d4   :  { %1439 = vst [vmem:[%s2502_s2 + $0xb0] sm:$0xff] %v1412_v22  ;;  %v1414_v23 = vpop.f32.mrb[15].mxu0 }
 0x1d5   :  { %1440 = vst [vmem:[%s2502_s2 + $0xb8] sm:$0xff] %v1414_v23 }

</bundles_post_ra>
